<compile_context>
chip_gen: v6e
topology: v6e:2x2x1
jax: 0.10.0
libtpu: 0.0.40
codegen_flags: <defaults>
</compile_context>

<pallas_src>
import functools

import jax
import jax.numpy as jnp
from jax.experimental import pallas as pl
from jax.experimental.pallas import tpu as pltpu


def _layernorm_kernel(x_ref, gamma_ref, beta_ref, o_ref, *, eps, inv_h):
    # x_ref: (TILE_ROWS, H) block in VMEM.
    x = x_ref[...].astype(jnp.float32)

    # Two-pass statistics (same formula as the PyTorch module), all in VMEM.
    mean = jnp.sum(x, axis=-1, keepdims=True) * inv_h
    xc = x - mean
    var = jnp.sum(xc * xc, axis=-1, keepdims=True) * inv_h
    inv_std = jax.lax.rsqrt(var + eps)

    y = xc * inv_std

    gamma = gamma_ref[...].astype(jnp.float32)   # (1, H) — implicit broadcast
    beta = beta_ref[...].astype(jnp.float32)     # (1, H)
    o_ref[...] = (gamma * y + beta).astype(o_ref.dtype)


def _choose_tile_rows(n_rows, hidden, dtype_bytes,
                      target_block_bytes=2 << 20,   # ~2 MiB input tile
                      max_block_bytes=4 << 20):     # 2x(in+out) stays << 32 MiB
    """Pick a tile row count giving a roofline-friendly block size."""
    row_bytes = max(hidden * dtype_bytes, 1)
    # Sublane packing multiple: 8 for 4-byte dtypes, 16 for bf16, 32 for int8.
    mult = max(8, 32 // dtype_bytes)
    rows = max(target_block_bytes // row_bytes, mult)
    rows = min(rows, max(max_block_bytes // row_bytes, mult))
    rows = max((rows // mult) * mult, mult)
    # No point making the tile larger than the whole (rounded-up) problem.
    rows = min(rows, ((n_rows + mult - 1) // mult) * mult)
    return int(max(rows, mult))


def layer_norm_pallas(x, gamma, beta, eps=1e-5, tile_rows=None):
    """LayerNorm over the last axis (parameters_shape = (H,))."""
    orig_shape = x.shape
    H = orig_shape[-1]
    x2 = x.reshape(-1, H)                 # [N, H]  (free reshape: last dim kept)
    N = x2.shape[0]
    dtype_bytes = jnp.dtype(x2.dtype).itemsize

    if tile_rows is None:
        tile_rows = _choose_tile_rows(N, H, dtype_bytes)

    gamma2 = gamma.reshape(1, H)
    beta2 = beta.reshape(1, H)

    # No padding copy: ragged last block is masked by Pallas (rows independent).
    grid = (pl.cdiv(N, tile_rows),)

    # Explicit VMEM budget: double-buffered input + output tiles, resident
    # gamma/beta, plus headroom for the f32 working set.  Capped at 32 MiB so
    # it is valid on every generation (v5e/v6e/v7x scoped limits).
    block_bytes = tile_rows * H * dtype_bytes
    param_bytes = 2 * H * 4
    vmem_limit = min(6 * block_bytes + 4 * param_bytes + (8 << 20), 32 << 20)

    kernel = functools.partial(_layernorm_kernel, eps=float(eps), inv_h=1.0 / H)

    out = pl.pallas_call(
        kernel,
        out_shape=jax.ShapeDtypeStruct((N, H), x.dtype),
        grid_spec=pltpu.PrefetchScalarGridSpec(
            num_scalar_prefetch=0,
            grid=grid,
            in_specs=[
                pl.BlockSpec((tile_rows, H), lambda i: (i, 0)),   # x rows
                pl.BlockSpec((1, H), lambda i: (0, 0)),           # gamma (resident)
                pl.BlockSpec((1, H), lambda i: (0, 0)),           # beta  (resident)
            ],
            out_specs=pl.BlockSpec((tile_rows, H), lambda i: (i, 0)),
        ),
        compiler_params=pltpu.CompilerParams(
            dimension_semantics=("parallel",),     # row grid shards across TCs
            vmem_limit_bytes=int(vmem_limit),
        ),
    )(x2, gamma2, beta2)

    return out.reshape(orig_shape)


def _reference_layer_norm(x, gamma, beta, eps=1e-5):
    xf = x.astype(jnp.float32)
    mean = jnp.mean(xf, axis=-1, keepdims=True)
    var = jnp.mean((xf - mean) ** 2, axis=-1, keepdims=True)
    y = (xf - mean) / jnp.sqrt(var + eps)
    return (gamma * y + beta).astype(x.dtype)


if __name__ == "__main__":
    # Module: LayerNormalization(parameters_shape=(hidden,))
    batch, seq, hidden = 2, 8, 128   # hidden multiple of 128 -> lane-dense stores
    eps = 1e-5

    key = jax.random.PRNGKey(0)
    x = jax.random.normal(key, (batch, seq, hidden), dtype=jnp.float32)

    # Deterministic parameter init (matches nn.Parameter(ones)/(zeros))
    gamma = jnp.ones((hidden,), dtype=jnp.float32)
    beta = jnp.zeros((hidden,), dtype=jnp.float32)

    out = layer_norm_pallas(x, gamma, beta, eps=eps)
    out = jax.block_until_ready(out)

    ref = _reference_layer_norm(x, gamma, beta, eps=eps)
    assert out.shape == x.shape
    assert jnp.allclose(out, ref, atol=2e-5, rtol=1e-5), "mismatch vs reference"

    print("KERNEL_OK")
</pallas_src>

<mosaic_0001>
module attributes {stable_mosaic.version = 11 : i64} {
  func.func @_layernorm_kernel(%arg0: i32, %arg1: memref<16x128xf32, #tpu.memory_space<vmem>>, %arg2: memref<1x128xf32, #tpu.memory_space<vmem>>, %arg3: memref<1x128xf32, #tpu.memory_space<vmem>>, %arg4: memref<16x128xf32, #tpu.memory_space<vmem>>) attributes {dimension_semantics = [#tpu.dimension_semantics<parallel>], iteration_bounds = array<i64: 1>, scalar_prefetch = 0 : i64, scratch_operands = 0 : i64, tpu.core_type = #tpu.core_type<tc>, window_params = [{transform_indices = @transform_0, window_bounds = array<i64: 16, 128>}, {pipeline_mode = #tpu.pipeline_mode<synchronous>, transform_indices = @transform_1, window_bounds = array<i64: 1, 128>}, {pipeline_mode = #tpu.pipeline_mode<synchronous>, transform_indices = @transform_2, window_bounds = array<i64: 1, 128>}, {transform_indices = @transform_3, window_bounds = array<i64: 16, 128>}]} {
    %c0 = arith.constant 0 : index
    %c0_0 = arith.constant 0 : index
    %0 = vector.load %arg1[%c0, %c0_0] : memref<16x128xf32, #tpu.memory_space<vmem>>, vector<16x128xf32>
    %cst = arith.constant dense<0.000000e+00> : vector<16xf32>
    %1 = vector.multi_reduction <add>, %0, %cst [1] : vector<16x128xf32> to vector<16xf32>
    %2 = vector.shape_cast %1 : vector<16xf32> to vector<16x1xf32>
    %cst_1 = arith.constant 7.812500e-03 : f32
    %3 = vector.broadcast %cst_1 : f32 to vector<16x1xf32>
    %4 = arith.mulf %2, %3 : vector<16x1xf32>
    %5 = vector.broadcast %4 : vector<16x1xf32> to vector<16x128xf32>
    %6 = arith.subf %0, %5 : vector<16x128xf32>
    %7 = arith.mulf %6, %6 : vector<16x128xf32>
    %cst_2 = arith.constant dense<0.000000e+00> : vector<16xf32>
    %8 = vector.multi_reduction <add>, %7, %cst_2 [1] : vector<16x128xf32> to vector<16xf32>
    %9 = vector.shape_cast %8 : vector<16xf32> to vector<16x1xf32>
    %cst_3 = arith.constant 7.812500e-03 : f32
    %10 = vector.broadcast %cst_3 : f32 to vector<16x1xf32>
    %11 = arith.mulf %9, %10 : vector<16x1xf32>
    %cst_4 = arith.constant 9.99999974E-6 : f32
    %12 = vector.broadcast %cst_4 : f32 to vector<16x1xf32>
    %13 = arith.addf %11, %12 : vector<16x1xf32>
    %14 = math.rsqrt %13 : vector<16x1xf32>
    %15 = vector.broadcast %14 : vector<16x1xf32> to vector<16x128xf32>
    %16 = arith.mulf %6, %15 : vector<16x128xf32>
    %c0_5 = arith.constant 0 : index
    %c0_6 = arith.constant 0 : index
    %17 = vector.load %arg2[%c0_5, %c0_6] : memref<1x128xf32, #tpu.memory_space<vmem>>, vector<1x128xf32>
    %c0_7 = arith.constant 0 : index
    %c0_8 = arith.constant 0 : index
    %18 = vector.load %arg3[%c0_7, %c0_8] : memref<1x128xf32, #tpu.memory_space<vmem>>, vector<1x128xf32>
    %19 = vector.broadcast %17 : vector<1x128xf32> to vector<16x128xf32>
    %20 = arith.mulf %19, %16 : vector<16x128xf32>
    %21 = vector.broadcast %18 : vector<1x128xf32> to vector<16x128xf32>
    %22 = arith.addf %20, %21 : vector<16x128xf32>
    %c0_9 = arith.constant 0 : index
    %c0_10 = arith.constant 0 : index
    %23 = vector.load %arg4[%c0_9, %c0_10] : memref<16x128xf32, #tpu.memory_space<vmem>>, vector<16x128xf32>
    tpu.vector_store %arg4[%c0_9, %c0_10], %22 {strides = array<i32>} : memref<16x128xf32, #tpu.memory_space<vmem>>, vector<16x128xf32>,
    return
  }
  func.func @transform_0(%arg0: i32) -> (i32, i32) {
    %c0_i32 = arith.constant 0 : i32
    %c0_i32_0 = arith.constant 0 : i32
    return %arg0, %c0_i32 : i32, i32
  }
  func.func @transform_1(%arg0: i32) -> (i32, i32) {
    %c0_i32 = arith.constant 0 : i32
    %c0_i32_0 = arith.constant 0 : i32
    %c0_i32_1 = arith.constant 0 : i32
    return %c0_i32, %c0_i32_0 : i32, i32
  }
  func.func @transform_2(%arg0: i32) -> (i32, i32) {
    %c0_i32 = arith.constant 0 : i32
    %c0_i32_0 = arith.constant 0 : i32
    %c0_i32_1 = arith.constant 0 : i32
    return %c0_i32, %c0_i32_0 : i32, i32
  }
  func.func @transform_3(%arg0: i32) -> (i32, i32) {
    %c0_i32 = arith.constant 0 : i32
    %c0_i32_0 = arith.constant 0 : i32
    return %arg0, %c0_i32 : i32, i32
  }
}

</mosaic_0001>

<bundles_post_ra>
// kernel: tpu_custom_call.1
= control target key start
LH: loop header
LB: loop body
LE: loop exit
PB: predicated region body
PF: predicated region fallthrough
CT: control target
= control target key end

     0   :  { %8 = vsyncpa [#allocation3], 0  ;;  %s186_s0 = inlined_call_operand.hbm [shape: f32[16,128], index: 0, kind: input, shape index: {}]   ;;  %s187_s1 = inlined_call_operand.vmem [shape: f32[1,128], index: 1, kind: input, shape index: {}]   ;;  %s188_s2 = inlined_call_operand.vmem [shape: f32[1,128], index: 2, kind: input, shape index: {}]   ;;  %s189_s3 = inlined_call_operand.hbm [shape: f32[16,128], index: 3, kind: output, shape index: {}]  }
   0x1   :  { %9 = vsyncpa [#allocation4], 0  ;;  %s144_s12 = smov [#allocation2]  }
   0x2   :  { %s15_s13 = sshll.u32 %s144_s12, 4  ;;  %s16_s13 = int_to_ptr.vmem [resolvable:$true] %s15_s13 }
   0x3   :  { %s108_s14 = scalar_lea.vmem %s16_s13, 256  ;;  %p113_p1 = scmp.lt.s32.totalorder %s16_s13, %s16_s13 }
   0x4   :  { %p109_p0 = scmp.ne.s32.totalorder %s16_s13, %s108_s14  ;;  %p114_p2 = scmp.lt.s32.totalorder %s108_s14, %s108_s14 }
   0x6   :  { %p115_p3 = por %p114_p2, %p113_p1 }
   0x8   :  { %p116_p4 = pnand %p115_p3, %p109_p0 }
   0xa   :  { %119 = shalt.err (!%p116_p4)
}
   0xb   :  { %s145_s15 = smov 128   ;;  %s146_s16 = smov 8  }
   0xc   :  { %21 = dma.hbm_to_vmem [thread:$0]  %s186_s0, 256, %s16_s13, [#allocation3], %s145_s15, %s145_s15, %s146_s16  }
   0xd   :  { %140 = dma.done.wait [#allocation3], 256  }
   0xe   :  { %141 = vsyncadd [#allocation3], 4294967040  ;;  %v29_v0 = vld [vmem:[#allocation2] sm:$0xff]  ;;  %v30_v1 = vld [vmem:[#allocation2 + $0x8] sm:$0xff]  ;;  %s147_s22 = smov [#allocation5]  }
   0xf   :  { %31 = vadd.xlane.f32.xlu0 %v29_v0  ;;  %v90_v17 = vld [vmem:[%s187_s1] ss:$0 sm:$0xff]  ;;  %s78_s23 = sshll.u32 %s147_s22, 4  ;;  %s79_s23 = int_to_ptr.vmem [resolvable:$true] %s78_s23 }
  0x10   :  { %v91_v19 = vld [vmem:[%s188_s2] ss:$0 sm:$0xff]  ;;  %s120_s24 = scalar_lea.vmem %s79_s23, 256  ;;  %p125_p6 = scmp.lt.s32.totalorder %s79_s23, %s79_s23 }
  0x11   :  { %p121_p5 = scmp.ne.s32.totalorder %s79_s23, %s120_s24  ;;  %p126_p7 = scmp.lt.s32.totalorder %s120_s24, %s120_s24 }
  0x13   :  { %33 = vadd.xlane.f32.xlu0 %v30_v1  ;;  %p127_p8 = por %p126_p7, %p125_p6 }
  0x15   :  { %p128_p9 = pnand %p127_p8, %p121_p5 }
  0x98   :  { %v32_v2 = vpop.xlane.xlu0 %31 }
  0x99   :  { %v35_v3 = vmul.f32 0.0078125, %v32_v2 }
  0x9b   :  { %v37_v4 = vsub.f32 %v29_v0, %v35_v3 }
  0x9c   :  { %v34_v5 = vpop.xlane.xlu0 %33 }
  0x9d   :  { %v36_v6 = vmul.f32 0.0078125, %v34_v5  ;;  %v39_v7 = vmul.f32 %v37_v4, %v37_v4 }
  0x9f   :  { %v38_v8 = vsub.f32 %v30_v1, %v36_v6  ;;  %41 = vadd.xlane.f32.xlu1 %v39_v7 }
  0xa1   :  { %v40_v9 = vmul.f32 %v38_v8, %v38_v8 }
  0xa3   :  { %43 = vadd.xlane.f32.xlu1 %v40_v9 }
 0x128   :  { %v42_v10 = vpop.xlane.xlu1 %41 }
 0x129   :  { %v45_v11 = vmul.f32 0.0078125, %v42_v10 }
 0x12b   :  { %v47_v12 = vadd.f32 1e-05, %v45_v11 }
 0x12c   :  { %v44_v13 = vpop.xlane.xlu1 %43 }
 0x12d   :  { %96 = vrsqrt.f32 %v47_v12  ;;  %v46_v14 = vmul.f32 0.0078125, %v44_v13 }
 0x12f   :  { %v48_v15 = vadd.f32 1e-05, %v46_v14 }
 0x131   :  { %98 = vrsqrt.f32 %v48_v15 }
 0x13a   :  { %v97_v16 = vpop.eup %96 }
 0x13b   :  { %v51_v18 = vmul.f32 %v97_v16, %v37_v4 }
 0x13d   :  { %v61_v20 = vmul.f32 %v90_v17, %v51_v18 }
 0x13e   :  { %v99_v21 = vpop.eup %98 }
 0x13f   :  { %v52_v22 = vmul.f32 %v99_v21, %v38_v8  ;;  %v69_v23 = vadd.f32 %v91_v19, %v61_v20 }
 0x141   :  { %v62_v24 = vmul.f32 %v90_v17, %v52_v22  ;;  %71 = vst [vmem:[#allocation5] sm:$0xff] %v69_v23 }
 0x143   :  { %v70_v25 = vadd.f32 %v91_v19, %v62_v24 }
 0x145   :  { %72 = vst [vmem:[#allocation5 + $0x8] sm:$0xff] %v70_v25 }
 0x146   :  { %131 = shalt.err (!%p128_p9)
}
 0x147   :  { %84 = dma.vmem_to_hbm [thread:$0]  %s79_s23, 256, %s189_s3, [#allocation4], %s145_s15, %s145_s15, %s146_s16  }
 0x148   :  { %142 = dma.done.wait [#allocation4], 256  }
 0x149   :  { %143 = vsyncadd [#allocation4], 4294967040 }
 0x14a   :  { %88 = vsyncpa [#allocation3], 1 }
 0x14b   :  { %89 = vsyncpa [#allocation4], 1 }

</bundles_post_ra>
